<compile_context>
chip_gen: v7x
topology: tpu7x:2x2x1
jax: 0.10.0
libtpu: 0.0.40
codegen_flags: <defaults>
</compile_context>

<pallas_src>
import jax
import jax.numpy as jnp
from jax.experimental import pallas as pl
from jax.experimental.pallas import tpu as pltpu

_EPS = 1e-6  # clip to open interval (0, 1) so ppf stays finite (rbig does the same)

# Acklam's rational approximation coefficients for the inverse normal CDF.
_A = (-3.969683028665376e+01, 2.209460984245205e+02, -2.759285104469687e+02,
      1.383577518672690e+02, -3.066479806614716e+01, 2.506628277459239e+00)
_B = (-5.447609879822406e+01, 1.615858368580409e+02, -1.556989798598866e+02,
      6.680131188771972e+01, -1.328068155288572e+01)
_C = (-7.784894002430293e-03, -3.223964580411365e-01, -2.400758277161838e+00,
      -2.549732539343734e+00, 4.374664141464968e+00, 2.938163982698783e+00)
_D = (7.784695709041462e-03, 3.224671290700398e-01, 2.445134137142996e+00,
      3.754408661907416e+00)
_P_LOW = 0.02425
_P_HIGH = 1.0 - _P_LOW


def _ceil_div(a, b):
    return -(-a // b)


def _recip(d):
    # EUP approx reciprocal + one Newton step on the VPU (well beyond 2e-3 accuracy).
    r = pl.reciprocal(d, approx=True)
    return r * (2.0 - d * r)


def _central(q):
    # Odd function of q -> the sign fold in the kernel is exact for this branch.
    r = q * q
    num = ((((_A[0] * r + _A[1]) * r + _A[2]) * r + _A[3]) * r + _A[4]) * r + _A[5]
    den = ((((_B[0] * r + _B[1]) * r + _B[2]) * r + _B[3]) * r + _B[4]) * r + 1.0
    return num * q * _recip(den)


def _tail(q):
    # q = sqrt(-2*log(p_tail)); returns the LOW-tail value (positive magnitude sign handled outside)
    num = ((((_C[0] * q + _C[1]) * q + _C[2]) * q + _C[3]) * q + _C[4]) * q + _C[5]
    den = (((_D[0] * q + _D[1]) * q + _D[2]) * q + _D[3]) * q + 1.0
    return num * _recip(den)


def _gaussian_icdf_kernel(x_ref, o_ref):
    x = x_ref[...].astype(jnp.float32)
    p = jnp.clip(x, _EPS, 1.0 - _EPS)

    # Fold upper half onto the lower half via ppf(p) = -ppf(1-p).
    upper = p > 0.5
    sign = jnp.where(upper, jnp.float32(-1.0), jnp.float32(1.0))
    p_min = jnp.where(upper, 1.0 - p, p)        # in (_EPS, 0.5]; log/sqrt always finite

    is_tail = p_min < _P_LOW                    # matches original < / > boundary conditions

    q_tail = jnp.sqrt(-2.0 * jnp.log(p_min))    # 1 log + 1 sqrt per element (was 2 + 2)
    z_tail = _tail(q_tail)
    z_mid = _central(p_min - 0.5)

    z = sign * jnp.where(is_tail, z_tail, z_mid)
    o_ref[...] = z.astype(o_ref.dtype)


def gaussian_inverse_cdf(X, y=None, *, lanes=512, block_bytes=2 << 20):
    """Z = norm.ppf(clip(X, eps, 1-eps)) computed in a Pallas TPU kernel.

    X: any-shape float array with values in (0, 1). y is ignored (sklearn API).
    Returns float32 array of the same shape as X.
    """
    del y  # unused by the transform, kept for API parity with the nn.Module
    orig_shape = X.shape
    x_flat = jnp.ravel(X).astype(jnp.float32)
    n = int(x_flat.shape[0])

    # Lane-dense slab: last dim = `lanes` (multiple of 128), rows sized so one
    # block is ~block_bytes (default 2 MiB -> tile_rows=1024 at lanes=512).
    C = lanes
    rows_needed = _ceil_div(n, C)
    target_rows = max(8, (block_bytes // (C * 4)) // 8 * 8)
    tile_rows = min(target_rows, _ceil_div(rows_needed, 8) * 8)
    R = _ceil_div(rows_needed, tile_rows) * tile_rows
    n_pad = R * C

    if n_pad != n:
        # ppf(0.5) = 0 -> padding is harmless and finite; sliced off below.
        x_flat = jnp.concatenate(
            [x_flat, jnp.full((n_pad - n,), 0.5, jnp.float32)])
    x2 = x_flat.reshape(R, C)

    grid = (R // tile_rows,)
    cost = pl.CostEstimate(
        flops=40 * n_pad,
        transcendentals=4 * n_pad,          # log + sqrt + 2 approx reciprocals
        bytes_accessed=2 * 4 * n_pad,       # read f32 + write f32
    )

    out = pl.pallas_call(
        _gaussian_icdf_kernel,
        out_shape=jax.ShapeDtypeStruct((R, C), jnp.float32),
        grid_spec=pltpu.PrefetchScalarGridSpec(
            num_scalar_prefetch=0,
            grid=grid,
            in_specs=[pl.BlockSpec((tile_rows, C), lambda i: (i, 0))],
            out_specs=pl.BlockSpec((tile_rows, C), lambda i: (i, 0)),
        ),
        compiler_params=pltpu.CompilerParams(
            dimension_semantics=("parallel",)),   # shards across both TCs on v7x
        cost_estimate=cost,
    )(x2)

    return out.reshape(-1)[:n].reshape(orig_shape)


if __name__ == "__main__":
    key = jax.random.PRNGKey(0)
    # Small tabular example (n_samples, n_features); D deliberately not a
    # multiple of 128 to exercise the lane-dense reshape + padding path.
    N, D = 64, 48
    X = jax.random.uniform(key, (N, D), dtype=jnp.float32, minval=0.0, maxval=1.0)
    y = None  # unused (sklearn API compatibility)

    Z = gaussian_inverse_cdf(X, y)
    Z = jax.block_until_ready(Z)

    # Sanity check against a pure-JAX reference (ndtri).
    ref = jax.scipy.special.ndtri(jnp.clip(X, _EPS, 1.0 - _EPS))
    err = float(jnp.max(jnp.abs(Z - ref)))
    assert Z.shape == (N, D) and Z.dtype == jnp.float32
    assert err < 2e-3, f"max abs error too large: {err}"
    print("KERNEL_OK")
</pallas_src>

<mosaic_0001>
module attributes {stable_mosaic.version = 11 : i64} {
  func.func @_gaussian_icdf_kernel(%arg0: i32, %arg1: memref<8x512xf32, #tpu.memory_space<vmem>>, %arg2: memref<8x512xf32, #tpu.memory_space<vmem>>) attributes {dimension_semantics = [#tpu.dimension_semantics<parallel>], iteration_bounds = array<i64: 1>, scalar_prefetch = 0 : i64, scratch_operands = 0 : i64, tpu.core_type = #tpu.core_type<tc>, window_params = [{transform_indices = @transform_0, window_bounds = array<i64: 8, 512>}, {transform_indices = @transform_1, window_bounds = array<i64: 8, 512>}]} {
    %c0 = arith.constant 0 : index
    %c0_0 = arith.constant 0 : index
    %0 = vector.load %arg1[%c0, %c0_0] : memref<8x512xf32, #tpu.memory_space<vmem>>, vector<8x512xf32>
    %cst = arith.constant 9.99999997E-7 : f32
    %cst_1 = arith.constant 0.999998986 : f32
    %1 = vector.broadcast %cst : f32 to vector<8x512xf32>
    %2 = arith.maximumf %1, %0 : vector<8x512xf32>
    %3 = vector.broadcast %cst_1 : f32 to vector<8x512xf32>
    %4 = arith.minimumf %3, %2 : vector<8x512xf32>
    %cst_2 = arith.constant 5.000000e-01 : f32
    %5 = vector.broadcast %cst_2 : f32 to vector<8x512xf32>
    %6 = arith.cmpf ogt, %4, %5 : vector<8x512xf32>
    %cst_3 = arith.constant -1.000000e+00 : f32
    %cst_4 = arith.constant 1.000000e+00 : f32
    %7 = vector.broadcast %cst_3 : f32 to vector<8x512xf32>
    %8 = vector.broadcast %cst_4 : f32 to vector<8x512xf32>
    %9 = arith.select %6, %7, %8 : vector<8x512xi1>, vector<8x512xf32>
    %cst_5 = arith.constant 1.000000e+00 : f32
    %10 = vector.broadcast %cst_5 : f32 to vector<8x512xf32>
    %11 = arith.subf %10, %4 : vector<8x512xf32>
    %12 = arith.select %6, %11, %4 : vector<8x512xi1>, vector<8x512xf32>
    %cst_6 = arith.constant 2.425000e-02 : f32
    %13 = vector.broadcast %cst_6 : f32 to vector<8x512xf32>
    %14 = arith.cmpf olt, %12, %13 : vector<8x512xf32>
    %15 = math.log %12 : vector<8x512xf32>
    %cst_7 = arith.constant -2.000000e+00 : f32
    %16 = vector.broadcast %cst_7 : f32 to vector<8x512xf32>
    %17 = arith.mulf %16, %15 : vector<8x512xf32>
    %18 = math.sqrt %17 : vector<8x512xf32>
    %cst_8 = arith.constant -0.0077848942 : f32
    %19 = vector.broadcast %cst_8 : f32 to vector<8x512xf32>
    %20 = arith.mulf %19, %18 : vector<8x512xf32>
    %cst_9 = arith.constant -0.322396457 : f32
    %21 = vector.broadcast %cst_9 : f32 to vector<8x512xf32>
    %22 = arith.addf %20, %21 : vector<8x512xf32>
    %23 = arith.mulf %22, %18 : vector<8x512xf32>
    %cst_10 = arith.constant -2.40075827 : f32
    %24 = vector.broadcast %cst_10 : f32 to vector<8x512xf32>
    %25 = arith.addf %23, %24 : vector<8x512xf32>
    %26 = arith.mulf %25, %18 : vector<8x512xf32>
    %cst_11 = arith.constant -2.54973245 : f32
    %27 = vector.broadcast %cst_11 : f32 to vector<8x512xf32>
    %28 = arith.addf %26, %27 : vector<8x512xf32>
    %29 = arith.mulf %28, %18 : vector<8x512xf32>
    %cst_12 = arith.constant 4.37466431 : f32
    %30 = vector.broadcast %cst_12 : f32 to vector<8x512xf32>
    %31 = arith.addf %29, %30 : vector<8x512xf32>
    %32 = arith.mulf %31, %18 : vector<8x512xf32>
    %cst_13 = arith.constant 2.938164 : f32
    %33 = vector.broadcast %cst_13 : f32 to vector<8x512xf32>
    %34 = arith.addf %32, %33 : vector<8x512xf32>
    %cst_14 = arith.constant 0.00778469583 : f32
    %35 = vector.broadcast %cst_14 : f32 to vector<8x512xf32>
    %36 = arith.mulf %35, %18 : vector<8x512xf32>
    %cst_15 = arith.constant 0.322467119 : f32
    %37 = vector.broadcast %cst_15 : f32 to vector<8x512xf32>
    %38 = arith.addf %36, %37 : vector<8x512xf32>
    %39 = arith.mulf %38, %18 : vector<8x512xf32>
    %cst_16 = arith.constant 2.44513416 : f32
    %40 = vector.broadcast %cst_16 : f32 to vector<8x512xf32>
    %41 = arith.addf %39, %40 : vector<8x512xf32>
    %42 = arith.mulf %41, %18 : vector<8x512xf32>
    %cst_17 = arith.constant 3.7544086 : f32
    %43 = vector.broadcast %cst_17 : f32 to vector<8x512xf32>
    %44 = arith.addf %42, %43 : vector<8x512xf32>
    %45 = arith.mulf %44, %18 : vector<8x512xf32>
    %cst_18 = arith.constant 1.000000e+00 : f32
    %46 = vector.broadcast %cst_18 : f32 to vector<8x512xf32>
    %47 = arith.addf %45, %46 : vector<8x512xf32>
    %48 = tpu.reciprocal %47 {approx = true} : vector<8x512xf32> -> vector<8x512xf32>
    %49 = arith.mulf %47, %48 : vector<8x512xf32>
    %cst_19 = arith.constant 2.000000e+00 : f32
    %50 = vector.broadcast %cst_19 : f32 to vector<8x512xf32>
    %51 = arith.subf %50, %49 : vector<8x512xf32>
    %52 = arith.mulf %48, %51 : vector<8x512xf32>
    %53 = arith.mulf %34, %52 : vector<8x512xf32>
    %cst_20 = arith.constant 5.000000e-01 : f32
    %54 = vector.broadcast %cst_20 : f32 to vector<8x512xf32>
    %55 = arith.subf %12, %54 : vector<8x512xf32>
    %56 = arith.mulf %55, %55 : vector<8x512xf32>
    %cst_21 = arith.constant -39.6968307 : f32
    %57 = vector.broadcast %cst_21 : f32 to vector<8x512xf32>
    %58 = arith.mulf %57, %56 : vector<8x512xf32>
    %cst_22 = arith.constant 220.946106 : f32
    %59 = vector.broadcast %cst_22 : f32 to vector<8x512xf32>
    %60 = arith.addf %58, %59 : vector<8x512xf32>
    %61 = arith.mulf %60, %56 : vector<8x512xf32>
    %cst_23 = arith.constant -275.928497 : f32
    %62 = vector.broadcast %cst_23 : f32 to vector<8x512xf32>
    %63 = arith.addf %61, %62 : vector<8x512xf32>
    %64 = arith.mulf %63, %56 : vector<8x512xf32>
    %cst_24 = arith.constant 138.357758 : f32
    %65 = vector.broadcast %cst_24 : f32 to vector<8x512xf32>
    %66 = arith.addf %64, %65 : vector<8x512xf32>
    %67 = arith.mulf %66, %56 : vector<8x512xf32>
    %cst_25 = arith.constant -30.6647987 : f32
    %68 = vector.broadcast %cst_25 : f32 to vector<8x512xf32>
    %69 = arith.addf %67, %68 : vector<8x512xf32>
    %70 = arith.mulf %69, %56 : vector<8x512xf32>
    %cst_26 = arith.constant 2.50662827 : f32
    %71 = vector.broadcast %cst_26 : f32 to vector<8x512xf32>
    %72 = arith.addf %70, %71 : vector<8x512xf32>
    %cst_27 = arith.constant -54.4760971 : f32
    %73 = vector.broadcast %cst_27 : f32 to vector<8x512xf32>
    %74 = arith.mulf %73, %56 : vector<8x512xf32>
    %cst_28 = arith.constant 161.585831 : f32
    %75 = vector.broadcast %cst_28 : f32 to vector<8x512xf32>
    %76 = arith.addf %74, %75 : vector<8x512xf32>
    %77 = arith.mulf %76, %56 : vector<8x512xf32>
    %cst_29 = arith.constant -155.698975 : f32
    %78 = vector.broadcast %cst_29 : f32 to vector<8x512xf32>
    %79 = arith.addf %77, %78 : vector<8x512xf32>
    %80 = arith.mulf %79, %56 : vector<8x512xf32>
    %cst_30 = arith.constant 66.8013153 : f32
    %81 = vector.broadcast %cst_30 : f32 to vector<8x512xf32>
    %82 = arith.addf %80, %81 : vector<8x512xf32>
    %83 = arith.mulf %82, %56 : vector<8x512xf32>
    %cst_31 = arith.constant -13.2806816 : f32
    %84 = vector.broadcast %cst_31 : f32 to vector<8x512xf32>
    %85 = arith.addf %83, %84 : vector<8x512xf32>
    %86 = arith.mulf %85, %56 : vector<8x512xf32>
    %cst_32 = arith.constant 1.000000e+00 : f32
    %87 = vector.broadcast %cst_32 : f32 to vector<8x512xf32>
    %88 = arith.addf %86, %87 : vector<8x512xf32>
    %89 = arith.mulf %72, %55 : vector<8x512xf32>
    %90 = tpu.reciprocal %88 {approx = true} : vector<8x512xf32> -> vector<8x512xf32>
    %91 = arith.mulf %88, %90 : vector<8x512xf32>
    %cst_33 = arith.constant 2.000000e+00 : f32
    %92 = vector.broadcast %cst_33 : f32 to vector<8x512xf32>
    %93 = arith.subf %92, %91 : vector<8x512xf32>
    %94 = arith.mulf %90, %93 : vector<8x512xf32>
    %95 = arith.mulf %89, %94 : vector<8x512xf32>
    %96 = arith.select %14, %53, %95 : vector<8x512xi1>, vector<8x512xf32>
    %97 = arith.mulf %9, %96 : vector<8x512xf32>
    %c0_34 = arith.constant 0 : index
    %c0_35 = arith.constant 0 : index
    %98 = vector.load %arg2[%c0_34, %c0_35] : memref<8x512xf32, #tpu.memory_space<vmem>>, vector<8x512xf32>
    tpu.vector_store %arg2[%c0_34, %c0_35], %97 {strides = array<i32>} : memref<8x512xf32, #tpu.memory_space<vmem>>, vector<8x512xf32>,
    return
  }
  func.func @transform_0(%arg0: i32) -> (i32, i32) {
    %c0_i32 = arith.constant 0 : i32
    %c0_i32_0 = arith.constant 0 : i32
    return %arg0, %c0_i32 : i32, i32
  }
  func.func @transform_1(%arg0: i32) -> (i32, i32) {
    %c0_i32 = arith.constant 0 : i32
    %c0_i32_0 = arith.constant 0 : i32
    return %arg0, %c0_i32 : i32, i32
  }
}

</mosaic_0001>

<bundles_post_ra>
// kernel: tpu_custom_call.1
= control target key start
LH: loop header
LB: loop body
LE: loop exit
PB: predicated region body
PF: predicated region fallthrough
CT: control target
= control target key end

     0   :  { %6 = vsyncpa [#allocation3], 0  ;;  %s670_s0 = inlined_call_operand.hbm [shape: f32[8,512], index: 0, kind: input, shape index: {}]   ;;  %s671_s1 = inlined_call_operand.hbm [shape: f32[8,512], index: 1, kind: output, shape index: {}]  }
   0x1   :  { %7 = vsyncpa [#allocation4], 0  ;;  %s411_s6 = smov [#allocation2]   ;;  %s363_s10 = scalar_lea.hbm %s670_s0, 512 }
   0x2   :  { %s14_s7 = sshll.u32 %s411_s6, 4  ;;  %p364_p0 = scmp.ne.s32.totalorder %s670_s0, %s363_s10  ;;  %s15_s7 = int_to_ptr.vmem [resolvable:$true] %s14_s7 }
   0x3   :  { %p367_p1 = scmp.lt.u32.totalorder %s363_s10, %s670_s0 }
   0x5   :  { %p369_p2 = pnand %p367_p1, %p364_p0 }
   0x7   :  { %372 = shalt.err (!%p369_p2)
}
   0x8   :  { %s373_s15 = scalar_lea.vmem %s15_s7, 512  ;;  %p378_p4 = scmp.lt.s32.totalorder %s15_s7, %s15_s7 }
   0x9   :  { %p374_p3 = scmp.ne.s32.totalorder %s15_s7, %s373_s15  ;;  %p379_p5 = scmp.lt.s32.totalorder %s373_s15, %s373_s15 }
   0xb   :  { %p380_p6 = por %p379_p5, %p378_p4 }
   0xd   :  { %p381_p7 = pnand %p380_p6, %p374_p3 }
   0xf   :  { %384 = shalt.err (!%p381_p7)
}
  0x10   :  { %17 = dma.hbm_to_vmem [thread:$0]  %s670_s0, 512, %s15_s7, [#allocation3]  }
  0x11   :  { %407 = dma.done.wait [#allocation3], 512  }
  0x12   :  { %408 = vsyncadd [#allocation3], 4294966784  ;;  %v21_v0 = vld [vmem:[#allocation2] sm:$0xff]  ;;  %v22_v1 = vld [vmem:[#allocation2 + $0x8] sm:$0xff]  ;;  %s413_s0 = smov [#allocation5]  }
  0x13   :  { %v23_v2 = vld [vmem:[#allocation2 + $0x10] sm:$0xff]  ;;  %v25_v3 = vmax.f32 %v21_v0, 1e-06  ;;  %v26_v4 = vmax.f32 %v22_v1, 1e-06  ;;  %v24_v6 = vld [vmem:[#allocation2 + $0x18] sm:$0xff] }
  0x14   :  { %v27_v5 = vmax.f32 %v23_v2, 1e-06  ;;  %v28_v10 = vmax.f32 %v24_v6, 1e-06  ;;  %s315_s18 = sshll.u32 %s413_s0, 4  ;;  %s316_s18 = int_to_ptr.vmem [resolvable:$true] %s315_s18 }
  0x15   :  { %v436_v7 = vmin.f32 %v25_v3, 0.999999  ;;  %v438_v8 = vmin.f32 %v26_v4, 0.999999  ;;  %v412_v3 = vmov 1.0   ;;  %s385_s19 = scalar_lea.vmem %s316_s18, 512  ;;  %p390_p9 = scmp.lt.s32.totalorder %s316_s18, %s316_s18 }
  0x16   :  { %v440_v9 = vmin.f32 %v27_v5, 0.999999  ;;  %v458_v16 = vmin.f32 %v28_v10, 0.999999  ;;  %p386_p8 = scmp.ne.s32.totalorder %s316_s18, %s385_s19  ;;  %p391_p10 = scmp.lt.s32.totalorder %s385_s19, %s385_s19 }
  0x17   :  { %vm33_vm0 = vcmp.gt.f32.partialorder %v436_v7, 0.5  ;;  %v41_v11 = vsub.f32 1.0, %v436_v7  ;;  %vm34_vm1 = vcmp.gt.f32.partialorder %v438_v8, 0.5  ;;  %v42_v12 = vsub.f32 1.0, %v438_v8 }
  0x18   :  { %vm35_vm2 = vcmp.gt.f32.partialorder %v440_v9, 0.5  ;;  %v43_v13 = vsub.f32 1.0, %v440_v9  ;;  %v44_v23 = vsub.f32 1.0, %v458_v16  ;;  %vm36_vm3 = vcmp.gt.f32.partialorder %v458_v16, 0.5  ;;  %p392_p11 = por %p391_p10, %p390_p9 }
  0x19   :  { %v451_v14 = vsel %vm33_vm0, %v41_v11, %v436_v7  ;;  %v456_v15 = vsel %vm34_vm1, %v42_v12, %v438_v8  ;;  %v519_v4 = vsel %vm33_vm0, -1.0, %v412_v3  ;;  %v525_v6 = vsel %vm34_vm1, -1.0, %v412_v3 }
  0x1a   :  { %331 = vlog2.f32 %v451_v14  ;;  %v462_v17 = vadd.f32 -0.5, %v451_v14  ;;  %v466_v18 = vadd.f32 -0.5, %v456_v15  ;;  %v471_v19 = vsel %vm35_vm2, %v43_v13, %v440_v9  ;;  %p393_p12 = pnand %p392_p11, %p386_p8 }
  0x1b   :  { %333 = vlog2.f32 %v456_v15  ;;  %v479_v21 = vadd.f32 -0.5, %v471_v19  ;;  %v500_v34 = vsel %vm36_vm3, %v44_v23, %v458_v16  ;;  %vm49_vm12 = vcmp.lt.f32.partialorder %v451_v14, 0.02425 }
  0x1c   :  { %v475_v20 = vmul.f32 %v462_v17, %v462_v17  ;;  %335 = vlog2.f32 %v471_v19  ;;  %v483_v22 = vmul.f32 %v466_v18, %v466_v18  ;;  %v530_v12 = vadd.f32 -0.5, %v500_v34 }
  0x1d   :  { %v490_v26 = vmul.f32 %v479_v21, %v479_v21  ;;  %337 = vlog2.f32 %v500_v34  ;;  %vm50_vm13 = vcmp.lt.f32.partialorder %v456_v15, 0.02425  ;;  %vm51_vm14 = vcmp.lt.f32.partialorder %v471_v19, 0.02425 }
  0x1e   :  { %v193_v24 = vmul.f32 -39.69683, %v475_v20  ;;  %v233_v25 = vmul.f32 -54.476097, %v475_v20  ;;  %v194_v27 = vmul.f32 -39.69683, %v483_v22 }
  0x1f   :  { %v234_v28 = vmul.f32 -54.476097, %v483_v22  ;;  %v195_v31 = vmul.f32 -39.69683, %v490_v26  ;;  %v235_v33 = vmul.f32 -54.476097, %v490_v26 }
  0x20   :  { %v197_v29 = vadd.f32 220.9461, %v193_v24  ;;  %v237_v30 = vadd.f32 161.58583, %v233_v25  ;;  %v198_v37 = vadd.f32 220.9461, %v194_v27 }
  0x21   :  { %v238_v32 = vadd.f32 161.58583, %v234_v28  ;;  %v199_v41 = vadd.f32 220.9461, %v195_v31  ;;  %v239_v42 = vadd.f32 161.58583, %v235_v33 }
  0x22   :  { %v201_v35 = vmul.f32 %v197_v29, %v475_v20  ;;  %v241_v36 = vmul.f32 %v237_v30, %v475_v20  ;;  %v202_v53 = vmul.f32 %v198_v37, %v483_v22  ;;  %vm52_vm15 = vcmp.lt.f32.partialorder %v500_v34, 0.02425 }
  0x23   :  { %v242_v38 = vmul.f32 %v238_v32, %v483_v22  ;;  %v203_v55 = vmul.f32 %v199_v41, %v490_v26  ;;  %v243_v58 = vmul.f32 %v239_v42, %v490_v26 }
  0x24   :  { %v332_v39 = vpop.eup %331  ;;  %v245_v40 = vadd.f32 -155.69897, %v241_v36  ;;  %v205_v45 = vadd.f32 -275.9285, %v201_v35  ;;  %v206_v60 = vadd.f32 -275.9285, %v202_v53 }
  0x25   :  { %v334_v43 = vpop.eup %333  ;;  %v54_v44 = vmul.f32 0.6931472, %v332_v39  ;;  %v246_v46 = vadd.f32 -155.69897, %v242_v38  ;;  %v207_v0 = vadd.f32 -275.9285, %v203_v55  ;;  %v540_v39 = vmul.f32 %v530_v12, %v530_v12 }
  0x26   :  { %v336_v47 = vpop.eup %335  ;;  %v249_v48 = vmul.f32 %v245_v40, %v475_v20  ;;  %v56_v49 = vmul.f32 0.6931472, %v334_v43  ;;  %v209_v56 = vmul.f32 %v205_v45, %v475_v20  ;;  %v247_v1 = vadd.f32 -155.69897, %v243_v58 }
  0x27   :  { %v61_v50 = vmul.f32 -2.0, %v54_v44  ;;  %v250_v51 = vmul.f32 %v246_v46, %v483_v22  ;;  %v58_v54 = vmul.f32 0.6931472, %v336_v47  ;;  %v338_v2 = vpop.eup %337  ;;  %v210_v10 = vmul.f32 %v206_v60, %v483_v22 }
  0x28   :  { %v62_v52 = vmul.f32 -2.0, %v56_v49  ;;  %v253_v57 = vadd.f32 66.801315, %v249_v48  ;;  %v213_v62 = vadd.f32 138.35776, %v209_v56  ;;  %v251_v11 = vmul.f32 %v247_v1, %v490_v26 }
  0x29   :  { %339 = vrsqrt.f32 %v61_v50  ;;  %v254_v59 = vadd.f32 66.801315, %v250_v51  ;;  %v512_v61 = vmul.f32 -2.0, %v58_v54  ;;  %v211_v7 = vmul.f32 %v207_v0, %v490_v26 }
  0x2a   :  { %341 = vrsqrt.f32 %v62_v52  ;;  %v257_v63 = vmul.f32 %v253_v57, %v475_v20  ;;  %v217_v13 = vmul.f32 %v213_v62, %v475_v20  ;;  %v60_v24 = vmul.f32 0.6931472, %v338_v2 }
  0x2b   :  { %343 = vrsqrt.f32 %v512_v61  ;;  %v258_v5 = vmul.f32 %v254_v59, %v483_v22  ;;  %vm67_vm4 = vcmp.eq.f32.partialorder %v61_v50, inf  ;;  %vm69_vm5 = vcmp.eq.f32.partialorder %v61_v50, 0.0 }
  0x2c   :  { %v261_v23 = vadd.f32 -13.280682, %v257_v63  ;;  %v70_v25 = vand.u32 2147483648, %v61_v50  ;;  %v255_v27 = vadd.f32 66.801315, %v251_v11  ;;  %vm74_vm6 = vcmp.eq.f32.partialorder %v62_v52, inf }
  0x2d   :  { %vm76_vm7 = vcmp.eq.f32.partialorder %v62_v52, 0.0  ;;  %v77_v28 = vand.u32 2147483648, %v62_v52  ;;  %v262_v29 = vadd.f32 -13.280682, %v258_v5  ;;  %v214_v32 = vadd.f32 138.35776, %v210_v10 }
  0x2e   :  { %v259_v33 = vmul.f32 %v255_v27, %v490_v26  ;;  %v535_v35 = vmul.f32 -2.0, %v60_v24  ;;  %v221_v36 = vadd.f32 -30.664799, %v217_v13  ;;  %v265_v37 = vmul.f32 %v261_v23, %v475_v20 }
  0x2f   :  { %vm81_vm8 = vcmp.eq.f32.partialorder %v512_v61, inf  ;;  %vm83_vm9 = vcmp.eq.f32.partialorder %v512_v61, 0.0  ;;  %v84_v41 = vand.u32 2147483648, %v512_v61  ;;  %v266_v44 = vmul.f32 %v262_v29, %v483_v22 }
  0x30   :  { %v263_v45 = vadd.f32 -13.280682, %v259_v33  ;;  %345 = vrsqrt.f32 %v535_v35  ;;  %v557_v51 = vadd.f32 1.0, %v265_v37  ;;  %v218_v57 = vmul.f32 %v214_v32, %v483_v22 }
  0x31   :  { %v215_v58 = vadd.f32 138.35776, %v211_v7  ;;  %v225_v7 = vmul.f32 %v221_v36, %v475_v20  ;;  %v196_v27 = vmul.f32 -39.69683, %v540_v39  ;;  %vm88_vm10 = vcmp.eq.f32.partialorder %v535_v35, inf }
  0x32   :  { %v267_v2 = vmul.f32 %v263_v45, %v490_v26  ;;  %347 = vrcp.f32 %v557_v51  ;;  %v222_v20 = vadd.f32 -30.664799, %v218_v57  ;;  %vm90_vm11 = vcmp.eq.f32.partialorder %v535_v35, 0.0 }
  0x33   :  { %v340_v8 = vpop.eup %339  ;;  %v200_v45 = vadd.f32 220.9461, %v196_v27 }
  0x34   :  { %v342_v30 = vpop.eup %341  ;;  %v66_v31 = vmul.f32 %v340_v8, %v61_v50  ;;  %v584_v29 = vadd.f32 1.0, %v267_v2  ;;  %v226_v2 = vmul.f32 %v222_v20, %v483_v22 }
  0x35   :  { %v73_v38 = vmul.f32 %v342_v30, %v62_v52  ;;  %v344_v46 = vpop.eup %343  ;;  %v236_v30 = vmul.f32 -54.476097, %v540_v39 }
  0x36   :  { %v68_v40 = vsel %vm67_vm4, %v61_v50, %v66_v31  ;;  %v80_v54 = vmul.f32 %v344_v46, %v512_v61 }
  0x37   :  { %v547_v42 = vsel %vm69_vm5, %v70_v25, %v68_v40  ;;  %v75_v43 = vsel %vm74_vm6, %v62_v52, %v73_v38  ;;  %v563_v52 = vadd.f32 1.0, %v266_v44 }
  0x38   :  { %v93_v47 = vmul.f32 -0.007784894, %v547_v42  ;;  %v133_v48 = vmul.f32 0.007784696, %v547_v42  ;;  %v554_v49 = vsel %vm76_vm7, %v77_v28, %v75_v43  ;;  %v82_v62 = vsel %vm81_vm8, %v512_v61, %v80_v54 }
  0x39   :  { %v94_v50 = vmul.f32 -0.007784894, %v554_v49  ;;  %v134_v53 = vmul.f32 0.007784696, %v554_v49  ;;  %v572_v1 = vsel %vm83_vm9, %v84_v41, %v82_v62  ;;  %349 = vrcp.f32 %v563_v52 }
  0x3a   :  { %v97_v55 = vadd.f32 -0.32239646, %v93_v47  ;;  %v137_v56 = vadd.f32 0.32246712, %v133_v48  ;;  %v95_v11 = vmul.f32 -0.007784894, %v572_v1  ;;  %v346_v36 = vpop.eup %345  ;;  %v219_v41 = vmul.f32 %v215_v58, %v490_v26 }
  0x3b   :  { %v98_v59 = vadd.f32 -0.32239646, %v94_v50  ;;  %v138_v60 = vadd.f32 0.32246712, %v134_v53  ;;  %v135_v24 = vmul.f32 0.007784696, %v572_v1  ;;  %351 = vrcp.f32 %v584_v29 }
  0x3c   :  { %v101_v63 = vmul.f32 %v97_v55, %v547_v42  ;;  %v141_v0 = vmul.f32 %v137_v56, %v547_v42  ;;  %v99_v28 = vadd.f32 -0.32239646, %v95_v11  ;;  %v240_v48 = vadd.f32 161.58583, %v236_v30 }
  0x3d   :  { %v102_v5 = vmul.f32 %v98_v59, %v554_v49  ;;  %v142_v10 = vmul.f32 %v138_v60, %v554_v49  ;;  %v139_v33 = vadd.f32 0.32246712, %v135_v24  ;;  %v87_v55 = vmul.f32 %v346_v36, %v535_v35  ;;  %v348_v59 = vpop.eup %347 }
  0x3e   :  { %v105_v13 = vadd.f32 -2.4007583, %v101_v63  ;;  %v145_v23 = vadd.f32 2.4451342, %v141_v0  ;;  %v103_v40 = vmul.f32 %v99_v28, %v572_v1  ;;  %v91_v58 = vand.u32 2147483648, %v535_v35 }
  0x3f   :  { %v106_v25 = vadd.f32 -2.4007583, %v102_v5  ;;  %v146_v61 = vadd.f32 2.4451342, %v142_v10  ;;  %v143_v44 = vmul.f32 %v139_v33, %v572_v1  ;;  %v204_v0 = vmul.f32 %v200_v45, %v540_v39 }
  0x40   :  { %v149_v8 = vmul.f32 %v145_v23, %v547_v42  ;;  %v109_v31 = vmul.f32 %v105_v13, %v547_v42  ;;  %v107_v47 = vadd.f32 -2.4007583, %v103_v40  ;;  %v89_v5 = vsel %vm88_vm10, %v535_v35, %v87_v55 }
  0x41   :  { %v150_v32 = vmul.f32 %v146_v61, %v554_v49  ;;  %v110_v38 = vmul.f32 %v106_v25, %v554_v49  ;;  %v147_v54 = vadd.f32 2.4451342, %v143_v44  ;;  %v244_v10 = vmul.f32 %v240_v48, %v540_v39 }
  0x42   :  { %v153_v37 = vadd.f32 3.7544086, %v149_v8  ;;  %v113_v50 = vadd.f32 -2.5497324, %v109_v31  ;;  %v111_v62 = vmul.f32 %v107_v47, %v572_v1  ;;  %v223_v24 = vadd.f32 -30.664799, %v219_v41 }
  0x43   :  { %v154_v43 = vadd.f32 3.7544086, %v150_v32  ;;  %v114_v57 = vadd.f32 -2.5497324, %v110_v38  ;;  %v151_v63 = vmul.f32 %v147_v54, %v572_v1  ;;  %v350_v11 = vpop.eup %349  ;;  %v229_v25 = vadd.f32 2.5066283, %v225_v7 }
  0x44   :  { %v157_v46 = vmul.f32 %v153_v37, %v547_v42  ;;  %v117_v13 = vmul.f32 %v113_v50, %v547_v42  ;;  %v281_v61 = vmul.f32 %v348_v59, %v557_v51  ;;  %v613_v22 = vsel %vm90_vm11, %v91_v58, %v89_v5 }
  0x45   :  { %v158_v53 = vmul.f32 %v154_v43, %v554_v49  ;;  %v155_v23 = vadd.f32 3.7544086, %v151_v63  ;;  %v118_v27 = vmul.f32 %v114_v57, %v554_v49  ;;  %v115_v8 = vadd.f32 -2.5497324, %v111_v62  ;;  %v352_v35 = vpop.eup %351 }
  0x46   :  { %v161_v56 = vadd.f32 1.0, %v157_v46  ;;  %v96_v30 = vmul.f32 -0.007784894, %v613_v22  ;;  %v208_v31 = vadd.f32 -275.9285, %v204_v0  ;;  %v282_v20 = vmul.f32 %v350_v11, %v563_v52 }
  0x47   :  { %v162_v60 = vadd.f32 1.0, %v158_v53  ;;  %v159_v28 = vmul.f32 %v155_v23, %v572_v1  ;;  %v230_v32 = vadd.f32 2.5066283, %v226_v2  ;;  %v136_v33 = vmul.f32 0.007784696, %v613_v22 }
  0x48   :  { %353 = vrcp.f32 %v161_v56  ;;  %v248_v7 = vadd.f32 -155.69897, %v244_v10  ;;  %v121_v36 = vadd.f32 4.3746643, %v117_v13  ;;  %v227_v37 = vmul.f32 %v223_v24, %v490_v26 }
  0x49   :  { %355 = vrcp.f32 %v162_v60  ;;  %v163_v51 = vadd.f32 1.0, %v159_v28  ;;  %v100_v38 = vadd.f32 -0.32239646, %v96_v30  ;;  %v285_v40 = vsub.f32 2.0, %v281_v61 }
  0x4a   :  { %v122_v41 = vadd.f32 4.3746643, %v118_v27  ;;  %v140_v43 = vadd.f32 0.32246712, %v136_v33  ;;  %v252_v44 = vmul.f32 %v248_v7, %v540_v39  ;;  %v119_v45 = vmul.f32 %v115_v8, %v572_v1 }
  0x4b   :  { %357 = vrcp.f32 %v163_v51  ;;  %v104_v46 = vmul.f32 %v100_v38, %v613_v22  ;;  %v212_v52 = vmul.f32 %v208_v31, %v540_v39  ;;  %v273_v47 = vmul.f32 %v462_v17, %v229_v25 }
  0x4c   :  { %v286_v48 = vsub.f32 2.0, %v282_v20  ;;  %v144_v26 = vmul.f32 %v140_v43, %v613_v22  ;;  %v256_v50 = vadd.f32 66.801315, %v252_v44  ;;  %v125_v53 = vmul.f32 %v121_v36, %v547_v42 }
  0x4d   :  { %v274_v54 = vmul.f32 %v466_v18, %v230_v32  ;;  %v283_v55 = vmul.f32 %v352_v35, %v584_v29  ;;  %v108_v57 = vadd.f32 -2.4007583, %v104_v46  ;;  %v126_v62 = vmul.f32 %v122_v41, %v554_v49 }
  0x4e   :  { %v231_v63 = vadd.f32 2.5066283, %v227_v37  ;;  %v148_v0 = vadd.f32 2.4451342, %v144_v26  ;;  %v260_v17 = vmul.f32 %v256_v50, %v540_v39  ;;  %v289_v10 = vmul.f32 %v348_v59, %v285_v40 }
  0x4f   :  { %v123_v13 = vadd.f32 4.3746643, %v119_v45  ;;  %v216_v23 = vadd.f32 138.35776, %v212_v52  ;;  %v290_v24 = vmul.f32 %v350_v11, %v286_v48  ;;  %v129_v61 = vadd.f32 2.938164, %v125_v53 }
  0x50   :  { %v152_v25 = vmul.f32 %v148_v0, %v613_v22  ;;  %v264_v18 = vadd.f32 -13.280682, %v260_v17  ;;  %v287_v27 = vsub.f32 2.0, %v283_v55  ;;  %v112_v8 = vmul.f32 %v108_v57, %v613_v22 }
  0x51   :  { %v130_v49 = vadd.f32 2.938164, %v126_v62  ;;  %v127_v59 = vmul.f32 %v123_v13, %v572_v1  ;;  %v294_v20 = vmul.f32 %v290_v24, %v274_v54  ;;  %v275_v38 = vmul.f32 %v479_v21, %v231_v63 }
  0x52   :  { %v354_v58 = vpop.eup %353  ;;  %v156_v30 = vadd.f32 3.7544086, %v152_v25  ;;  %v268_v31 = vmul.f32 %v264_v18, %v540_v39  ;;  %v291_v40 = vmul.f32 %v352_v35, %v287_v27  ;;  %v116_v41 = vadd.f32 -2.5497324, %v112_v8 }
  0x53   :  { %v356_v2 = vpop.eup %355  ;;  %v169_v5 = vmul.f32 %v354_v58, %v161_v56  ;;  %v293_v56 = vmul.f32 %v289_v10, %v273_v47  ;;  %v131_v46 = vadd.f32 2.938164, %v127_v59  ;;  %v40_v13 = vsel %vm36_vm3, -1.0, %v412_v3 }
  0x54   :  { %v170_v42 = vmul.f32 %v356_v2, %v162_v60  ;;  %v220_v60 = vmul.f32 %v216_v23, %v540_v39  ;;  %v160_v33 = vmul.f32 %v156_v30, %v613_v22  ;;  %v272_v7 = vadd.f32 1.0, %v268_v31 }
  0x55   :  { %v173_v29 = vsub.f32 2.0, %v169_v5  ;;  %v358_v36 = vpop.eup %357  ;;  %v120_v35 = vmul.f32 %v116_v41, %v613_v22  ;;  %v295_v50 = vmul.f32 %v291_v40, %v275_v38 }
  0x56   :  { %v174_v28 = vsub.f32 2.0, %v170_v42  ;;  %v171_v44 = vmul.f32 %v358_v36, %v163_v51  ;;  %v164_v45 = vadd.f32 1.0, %v160_v33  ;;  %359 = vrcp.f32 %v272_v7 }
  0x57   :  { %v177_v32 = vmul.f32 %v354_v58, %v173_v29  ;;  %v224_v52 = vadd.f32 -30.664799, %v220_v60  ;;  %v124_v53 = vadd.f32 4.3746643, %v120_v35 }
  0x58   :  { %v178_v11 = vmul.f32 %v356_v2, %v174_v28  ;;  %v175_v26 = vsub.f32 2.0, %v171_v44  ;;  %361 = vrcp.f32 %v164_v45 }
  0x59   :  { %v181_v37 = vmul.f32 %v177_v32, %v129_v61  ;;  %v228_v14 = vmul.f32 %v224_v52, %v540_v39  ;;  %v128_v58 = vmul.f32 %v124_v53, %v613_v22 }
  0x5a   :  { %v182_v43 = vmul.f32 %v178_v11, %v130_v49  ;;  %v179_v51 = vmul.f32 %v358_v36, %v175_v26 }
  0x5b   :  { %v297_v1 = vsel %vm49_vm12, %v181_v37, %v293_v56  ;;  %v232_v57 = vadd.f32 2.5066283, %v228_v14  ;;  %v132_v39 = vadd.f32 2.938164, %v128_v58 }
  0x5c   :  { %v301_v47 = vmul.f32 %v297_v1, %v519_v4  ;;  %v298_v48 = vsel %vm50_vm13, %v182_v43, %v294_v20  ;;  %v39_v4 = vsel %vm35_vm2, -1.0, %v412_v3  ;;  %v183_v15 = vmul.f32 %v179_v51, %v131_v46 }
  0x5d   :  { %v302_v21 = vmul.f32 %v298_v48, %v525_v6  ;;  %v276_v19 = vmul.f32 %v530_v12, %v232_v57 }
  0x5e   :  { %305 = vst [vmem:[#allocation5] sm:$0xff] %v301_v47  ;;  %v299_v54 = vsel %vm51_vm14, %v183_v15, %v295_v50 }
  0x5f   :  { %306 = vst [vmem:[#allocation5 + $0x8] sm:$0xff] %v302_v21  ;;  %v303_v55 = vmul.f32 %v299_v54, %v39_v4 }
  0x60   :  { %v360_v6 = vpop.eup %359 }
  0x61   :  { %307 = vst [vmem:[#allocation5 + $0x10] sm:$0xff] %v303_v55  ;;  %v284_v62 = vmul.f32 %v360_v6, %v272_v7 }
  0x62   :  { %v362_v63 = vpop.eup %361 }
  0x63   :  { %v172_v0 = vmul.f32 %v362_v63, %v164_v45  ;;  %v288_v17 = vsub.f32 2.0, %v284_v62 }
  0x65   :  { %v176_v2 = vsub.f32 2.0, %v172_v0  ;;  %v292_v5 = vmul.f32 %v360_v6, %v288_v17 }
  0x67   :  { %v180_v9 = vmul.f32 %v362_v63, %v176_v2  ;;  %v296_v10 = vmul.f32 %v292_v5, %v276_v19 }
  0x69   :  { %v184_v23 = vmul.f32 %v180_v9, %v132_v39 }
  0x6b   :  { %v300_v22 = vsel %vm52_vm15, %v184_v23, %v296_v10 }
  0x6c   :  { %v304_v42 = vmul.f32 %v300_v22, %v40_v13 }
  0x6e   :  { %308 = vst [vmem:[#allocation5 + $0x18] sm:$0xff] %v304_v42 }
  0x6f   :  { %396 = shalt.err (!%p393_p12)
}
  0x70   :  { %s397_s22 = scalar_lea.hbm %s671_s1, 512 }
  0x71   :  { %p398_p13 = scmp.ne.s32.totalorder %s671_s1, %s397_s22  ;;  %p401_p0 = scmp.lt.u32.totalorder %s397_s22, %s671_s1 }
  0x73   :  { %p403_p1 = pnand %p401_p0, %p398_p13 }
  0x75   :  { %406 = shalt.err (!%p403_p1)
}
  0x76   :  { %318 = dma.vmem_to_hbm [thread:$0]  %s316_s18, 512, %s671_s1, [#allocation4]  }
  0x77   :  { %409 = dma.done.wait [#allocation4], 512  }
  0x78   :  { %410 = vsyncadd [#allocation4], 4294966784 }
  0x79   :  { %322 = vsyncpa [#allocation3], 1 }
  0x7a   :  { %323 = vsyncpa [#allocation4], 1 }

</bundles_post_ra>
